<compile_context>
chip_gen: v7x
topology: tpu7x:2x2x1
jax: 0.10.0
libtpu: 0.0.40
codegen_flags: <defaults>
</compile_context>

<pallas_src>
import jax
import jax.numpy as jnp
from jax import lax
from jax.experimental import pallas as pl
from jax.experimental.pallas import tpu as pltpu


def _attention_kernel(xq_ref, xkv_ref, wq_ref, wk_ref, wv_ref, wo_ref, bo_ref,
                      o_ref, acc_ref):
    """One (batch, query-tile, head) grid step.

    xq_ref : (1, tq, D)   query-token slab
    xkv_ref: (1, N,  D)   full-sequence slab (keys/values come from the same x)
    wq_ref : (1, D, dh)   per-head Q projection (softmax scale pre-folded)
    wk_ref : (1, D, dh)
    wv_ref : (1, D, dh)
    wo_ref : (1, dh, Dp)  per-head slice of the output projection (Dp lane-padded)
    bo_ref : (1, Dp)      output bias (lane-padded)
    o_ref  : (1, tq, Dp)  written once, on the last head
    acc_ref: (tq, Dp)     f32 accumulator over heads (initialized with the bias)
    """
    h = pl.program_id(2)
    num_heads = pl.num_programs(2)

    @pl.when(h == 0)
    def _init():
        # Fold the output bias into the accumulator init so the finalize is a
        # single cast+store (no extra VPU add on the last head).
        acc_ref[...] = jnp.broadcast_to(bo_ref[...].astype(jnp.float32),
                                        acc_ref.shape)

    in_dtype = xq_ref.dtype
    xq = xq_ref[0]                       # (tq, D)
    xkv = xkv_ref[0]                     # (N, D)

    # Per-head projections: MXU with f32 accumulation, fed back in the input dtype
    # (so bf16 inputs keep bf16 MXU feeds while all accumulation stays f32).
    q = jnp.dot(xq, wq_ref[0], preferred_element_type=jnp.float32).astype(in_dtype)   # (tq, dh)
    k = jnp.dot(xkv, wk_ref[0], preferred_element_type=jnp.float32).astype(in_dtype)  # (N, dh)
    v = jnp.dot(xkv, wv_ref[0], preferred_element_type=jnp.float32).astype(in_dtype)  # (N, dh)

    # scores = q @ k^T without an explicit transpose: contract the last dims.
    s = lax.dot_general(q, k, (((1,), (1,)), ((), ())),
                        preferred_element_type=jnp.float32)                            # (tq, N)

    # Numerically stable softmax in f32; EUP approx reciprocal for the denominator
    # (separate bundle slot -> essentially free vs. a VALU divide).
    m = jnp.max(s, axis=-1, keepdims=True)
    p = jnp.exp(s - m)
    attn = p * pl.reciprocal(jnp.sum(p, axis=-1, keepdims=True), approx=True)
    # TODO(synk): dropout is a no-op here (p=0.0 in the reference configuration).

    ctx = jnp.dot(attn.astype(in_dtype), v,
                  preferred_element_type=jnp.float32).astype(in_dtype)                 # (tq, dh)

    # Fold this head's contribution straight into the output-projection accumulator.
    acc_ref[...] += jnp.dot(ctx, wo_ref[0], preferred_element_type=jnp.float32)        # (tq, Dp)

    @pl.when(h == num_heads - 1)
    def _finalize():
        o_ref[0] = acc_ref[...].astype(o_ref.dtype)


def _vmem_limit_bytes(N, tq, D, Dp, dim_head, itemsize):
    """Explicit VMEM budget (double-buffered blocks + scratch + live f32 temps)."""
    dbl = 2
    blocks = (dbl * tq * D * itemsize               # x query block
              + dbl * N * D * itemsize              # x key/value block
              + dbl * 3 * D * dim_head * itemsize   # wq / wk / wv
              + dbl * dim_head * Dp * itemsize      # wo
              + dbl * Dp * itemsize                 # bias
              + dbl * tq * Dp * itemsize            # output block
              + tq * Dp * 4)                        # f32 accumulator scratch
    live = (tq + 2 * N) * dim_head * 4 + 2 * tq * N * 4   # q/k/v + scores/probs (f32)
    est = 2 * (blocks + live) + (4 << 20)                 # 2x headroom + 4 MiB slack
    # Clamp so it also fits v7x's 64 MiB physical VMEM; floor keeps compiler scratch happy.
    return int(min(max(est, 32 << 20), 64 << 20))


def attention_forward(x, w_qkv, w_out, b_out, *, heads, dim_head):
    """x: (B, N, D); w_qkv: (D, 3*heads*dim_head); w_out: (heads*dim_head, D); b_out: (1, D)."""
    B, N, D = x.shape
    inner = heads * dim_head
    assert w_qkv.shape == (D, 3 * inner)
    assert w_out.shape == (inner, D)
    assert b_out.shape == (1, D)
    scale = dim_head ** -0.5

    # ---- host-side weight re-layout (one-time) -------------------------------
    w_q, w_k, w_v = jnp.split(w_qkv, 3, axis=1)            # each (D, inner)

    def per_head(w):                                        # (D, inner) -> (H, D, dh)
        return w.reshape(D, heads, dim_head).transpose(1, 0, 2)

    wq = per_head(w_q) * jnp.asarray(scale, w_q.dtype)      # fold softmax scale into Q
    wk = per_head(w_k)
    wv = per_head(w_v)
    wo = w_out.reshape(heads, dim_head, D)                  # (H, dh, D)

    # Lane-dense output: pad the embed dim up to a multiple of 128 so the output
    # store is an unmasked full-lane vst; sliced back on the host afterwards.
    Dp = max(128, ((D + 127) // 128) * 128)
    if Dp != D:
        wo = jnp.pad(wo, ((0, 0), (0, 0), (0, Dp - D)))
        b_out_p = jnp.pad(b_out, ((0, 0), (0, Dp - D)))
    else:
        b_out_p = b_out

    # Query tiling: 128-row tiles when they divide N, otherwise a single full tile.
    tq = 128 if (N % 128 == 0) else N
    # TODO(synk): for very large N also tile K/V with an online-softmax (flash)
    # accumulator instead of materializing the full (tq, N) score tile per head.

    grid = (B, N // tq, heads)
    vmem_limit = _vmem_limit_bytes(N, tq, D, Dp, dim_head, x.dtype.itemsize)

    y = pl.pallas_call(
        _attention_kernel,
        out_shape=jax.ShapeDtypeStruct((B, N, Dp), x.dtype),
        grid_spec=pltpu.PrefetchScalarGridSpec(
            num_scalar_prefetch=0,
            grid=grid,
            in_specs=[
                pl.BlockSpec((1, tq, D), lambda b, qi, h: (b, qi, 0)),        # x (query rows)
                pl.BlockSpec((1, N, D), lambda b, qi, h: (b, 0, 0)),          # x (key/value rows)
                pl.BlockSpec((1, D, dim_head), lambda b, qi, h: (h, 0, 0)),   # wq (scale folded)
                pl.BlockSpec((1, D, dim_head), lambda b, qi, h: (h, 0, 0)),   # wk
                pl.BlockSpec((1, D, dim_head), lambda b, qi, h: (h, 0, 0)),   # wv
                pl.BlockSpec((1, dim_head, Dp), lambda b, qi, h: (h, 0, 0)),  # wo (per head)
                pl.BlockSpec((1, Dp), lambda b, qi, h: (0, 0)),               # bias
            ],
            out_specs=pl.BlockSpec((1, tq, Dp), lambda b, qi, h: (b, qi, 0)),
            scratch_shapes=[pltpu.VMEM((tq, Dp), jnp.float32)],
        ),
        compiler_params=pltpu.CompilerParams(
            dimension_semantics=("parallel", "parallel", "arbitrary"),
            vmem_limit_bytes=vmem_limit,
        ),
    )(x, x, wq, wk, wv, wo, b_out_p)

    return y[..., :D] if Dp != D else y


def reference_attention(x, w_qkv, w_out, b_out, *, heads, dim_head):
    """Pure-JAX reference mirroring the PyTorch forward."""
    B, N, D = x.shape
    inner = heads * dim_head
    scale = dim_head ** -0.5
    qkv = jnp.einsum('bnd,de->bne', x, w_qkv)
    q, k, v = jnp.split(qkv, 3, axis=-1)

    def to_heads(t):
        return t.reshape(B, N, heads, dim_head).transpose(0, 2, 1, 3)

    q, k, v = map(to_heads, (q, k, v))
    dots = jnp.einsum('bhqd,bhkd->bhqk', q, k) * scale
    attn = jax.nn.softmax(dots, axis=-1)
    out = jnp.einsum('bhqk,bhkd->bhqd', attn, v)
    out = out.transpose(0, 2, 1, 3).reshape(B, N, inner)
    return jnp.einsum('bni,id->bnd', out, w_out) + b_out[0]


if __name__ == "__main__":
    # Small shapes consistent with the module's forward: x is (batch, tokens, dim).
    B, N, D = 2, 8, 32
    heads, dim_head = 4, 16
    inner = heads * dim_head

    key = jax.random.PRNGKey(0)
    k_x, k_qkv, k_out, k_b = jax.random.split(key, 4)

    x = jax.random.normal(k_x, (B, N, D), dtype=jnp.float32)
    # Deterministic synthetic parameters (nn.Linear-like scale).
    w_qkv = jax.random.normal(k_qkv, (D, 3 * inner), dtype=jnp.float32) * (D ** -0.5)
    w_out = jax.random.normal(k_out, (inner, D), dtype=jnp.float32) * (inner ** -0.5)
    b_out = jax.random.normal(k_b, (1, D), dtype=jnp.float32) * 0.01

    y = attention_forward(x, w_qkv, w_out, b_out, heads=heads, dim_head=dim_head)
    y = jax.block_until_ready(y)

    y_ref = reference_attention(x, w_qkv, w_out, b_out, heads=heads, dim_head=dim_head)
    assert y.shape == (B, N, D)
    # Tolerance slightly loosened vs. exact f32 because the softmax denominator uses
    # the EUP approximate reciprocal (~2^-12 relative error).
    assert jnp.allclose(y, y_ref, atol=5e-3, rtol=5e-3), float(jnp.max(jnp.abs(y - y_ref)))

    print("KERNEL_OK")
</pallas_src>

<mosaic_0001>
module attributes {stable_mosaic.version = 11 : i64} {
  func.func @_attention_kernel(%arg0: i32, %arg1: i32, %arg2: i32, %arg3: memref<1x8x32xf32, #tpu.memory_space<vmem>>, %arg4: memref<1x8x32xf32, #tpu.memory_space<vmem>>, %arg5: memref<1x32x16xf32, #tpu.memory_space<vmem>>, %arg6: memref<1x32x16xf32, #tpu.memory_space<vmem>>, %arg7: memref<1x32x16xf32, #tpu.memory_space<vmem>>, %arg8: memref<1x16x128xf32, #tpu.memory_space<vmem>>, %arg9: memref<1x128xf32, #tpu.memory_space<vmem>>, %arg10: memref<1x8x128xf32, #tpu.memory_space<vmem>>, %arg11: memref<8x128xf32, #tpu.memory_space<vmem>>) attributes {dimension_semantics = [#tpu.dimension_semantics<parallel>, #tpu.dimension_semantics<parallel>, #tpu.dimension_semantics<arbitrary>], iteration_bounds = array<i64: 2, 1, 4>, scalar_prefetch = 0 : i64, scratch_operands = 1 : i64, tpu.core_type = #tpu.core_type<tc>, window_params = [{transform_indices = @transform_0, window_bounds = array<i64: 1, 8, 32>}, {transform_indices = @transform_1, window_bounds = array<i64: 1, 8, 32>}, {transform_indices = @transform_2, window_bounds = array<i64: 1, 32, 16>}, {transform_indices = @transform_3, window_bounds = array<i64: 1, 32, 16>}, {transform_indices = @transform_4, window_bounds = array<i64: 1, 32, 16>}, {transform_indices = @transform_5, window_bounds = array<i64: 1, 16, 128>}, {pipeline_mode = #tpu.pipeline_mode<synchronous>, transform_indices = @transform_6, window_bounds = array<i64: 1, 128>}, {transform_indices = @transform_7, window_bounds = array<i64: 1, 8, 128>}]} {
    %c0_i32 = arith.constant 0 : i32
    %0 = arith.cmpi eq, %arg2, %c0_i32 : i32
    %1 = arith.extui %0 : i1 to i32
    %c0_i32_0 = arith.constant 0 : i32
    %2 = arith.cmpi ne, %1, %c0_i32_0 : i32
    scf.if %2 {
      %c0_30 = arith.constant 0 : index
      %c0_31 = arith.constant 0 : index
      %37 = vector.load %arg9[%c0_30, %c0_31] : memref<1x128xf32, #tpu.memory_space<vmem>>, vector<1x128xf32>
      %38 = vector.shape_cast %37 : vector<1x128xf32> to vector<1x128xf32>
      %39 = vector.broadcast %38 : vector<1x128xf32> to vector<8x128xf32>
      %c0_32 = arith.constant 0 : index
      %c0_33 = arith.constant 0 : index
      %40 = vector.load %arg11[%c0_32, %c0_33] : memref<8x128xf32, #tpu.memory_space<vmem>>, vector<8x128xf32>
      tpu.vector_store %arg11[%c0_32, %c0_33], %39 {strides = array<i32>} : memref<8x128xf32, #tpu.memory_space<vmem>>, vector<8x128xf32>,
    } else {
    }
    %c0 = arith.constant 0 : index
    %c0_1 = arith.constant 0 : index
    %c0_2 = arith.constant 0 : index
    %3 = vector.load %arg3[%c0, %c0_1, %c0_2] : memref<1x8x32xf32, #tpu.memory_space<vmem>>, vector<1x8x32xf32>
    %4 = vector.shape_cast %3 : vector<1x8x32xf32> to vector<8x32xf32>
    %c0_3 = arith.constant 0 : index
    %c0_4 = arith.constant 0 : index
    %c0_5 = arith.constant 0 : index
    %5 = vector.load %arg4[%c0_3, %c0_4, %c0_5] : memref<1x8x32xf32, #tpu.memory_space<vmem>>, vector<1x8x32xf32>
    %6 = vector.shape_cast %5 : vector<1x8x32xf32> to vector<8x32xf32>
    %c0_6 = arith.constant 0 : index
    %c0_7 = arith.constant 0 : index
    %c0_8 = arith.constant 0 : index
    %7 = vector.load %arg5[%c0_6, %c0_7, %c0_8] : memref<1x32x16xf32, #tpu.memory_space<vmem>>, vector<1x32x16xf32>
    %8 = vector.shape_cast %7 : vector<1x32x16xf32> to vector<32x16xf32>
    %cst = arith.constant dense<0.000000e+00> : vector<8x16xf32>
    %9 = tpu.matmul %4, %8, %cst {dimension_numbers = #tpu.dot_dimension_numbers<[1], [0], [0], [1], [0, 0, 1, 1], [], []>} : vector<8x32xf32>, vector<32x16xf32>, vector<8x16xf32> -> vector<8x16xf32>
    %c0_9 = arith.constant 0 : index
    %c0_10 = arith.constant 0 : index
    %c0_11 = arith.constant 0 : index
    %10 = vector.load %arg6[%c0_9, %c0_10, %c0_11] : memref<1x32x16xf32, #tpu.memory_space<vmem>>, vector<1x32x16xf32>
    %11 = vector.shape_cast %10 : vector<1x32x16xf32> to vector<32x16xf32>
    %cst_12 = arith.constant dense<0.000000e+00> : vector<8x16xf32>
    %12 = tpu.matmul %6, %11, %cst_12 {dimension_numbers = #tpu.dot_dimension_numbers<[1], [0], [0], [1], [0, 0, 1, 1], [], []>} : vector<8x32xf32>, vector<32x16xf32>, vector<8x16xf32> -> vector<8x16xf32>
    %c0_13 = arith.constant 0 : index
    %c0_14 = arith.constant 0 : index
    %c0_15 = arith.constant 0 : index
    %13 = vector.load %arg7[%c0_13, %c0_14, %c0_15] : memref<1x32x16xf32, #tpu.memory_space<vmem>>, vector<1x32x16xf32>
    %14 = vector.shape_cast %13 : vector<1x32x16xf32> to vector<32x16xf32>
    %cst_16 = arith.constant dense<0.000000e+00> : vector<8x16xf32>
    %15 = tpu.matmul %6, %14, %cst_16 {dimension_numbers = #tpu.dot_dimension_numbers<[1], [0], [0], [1], [0, 0, 1, 1], [], []>} : vector<8x32xf32>, vector<32x16xf32>, vector<8x16xf32> -> vector<8x16xf32>
    %cst_17 = arith.constant dense<0.000000e+00> : vector<8x8xf32>
    %16 = tpu.matmul %9, %12, %cst_17 {dimension_numbers = #tpu.dot_dimension_numbers<[1], [1], [0], [0], [0, 0, 1, 0], [], []>} : vector<8x16xf32>, vector<8x16xf32>, vector<8x8xf32> -> vector<8x8xf32>
    %cst_18 = arith.constant dense<0xFF800000> : vector<8xf32>
    %17 = vector.multi_reduction <maximumf>, %16, %cst_18 [1] : vector<8x8xf32> to vector<8xf32>
    %18 = vector.shape_cast %17 : vector<8xf32> to vector<8x1xf32>
    %19 = vector.broadcast %18 : vector<8x1xf32> to vector<8x8xf32>
    %20 = arith.subf %16, %19 : vector<8x8xf32>
    %21 = math.exp %20 : vector<8x8xf32>
    %cst_19 = arith.constant dense<0.000000e+00> : vector<8xf32>
    %22 = vector.multi_reduction <add>, %21, %cst_19 [1] : vector<8x8xf32> to vector<8xf32>
    %23 = vector.shape_cast %22 : vector<8xf32> to vector<8x1xf32>
    %24 = tpu.reciprocal %23 {approx = true} : vector<8x1xf32> -> vector<8x1xf32>
    %25 = vector.broadcast %24 : vector<8x1xf32> to vector<8x8xf32>
    %26 = arith.mulf %21, %25 : vector<8x8xf32>
    %cst_20 = arith.constant dense<0.000000e+00> : vector<8x16xf32>
    %27 = tpu.matmul %26, %15, %cst_20 {dimension_numbers = #tpu.dot_dimension_numbers<[1], [0], [0], [1], [0, 0, 1, 1], [], []>} : vector<8x8xf32>, vector<8x16xf32>, vector<8x16xf32> -> vector<8x16xf32>
    %c0_21 = arith.constant 0 : index
    %c0_22 = arith.constant 0 : index
    %28 = vector.load %arg11[%c0_21, %c0_22] : memref<8x128xf32, #tpu.memory_space<vmem>>, vector<8x128xf32>
    %c0_23 = arith.constant 0 : index
    %c0_24 = arith.constant 0 : index
    %c0_25 = arith.constant 0 : index
    %29 = vector.load %arg8[%c0_23, %c0_24, %c0_25] : memref<1x16x128xf32, #tpu.memory_space<vmem>>, vector<1x16x128xf32>
    %30 = vector.shape_cast %29 : vector<1x16x128xf32> to vector<16x128xf32>
    %cst_26 = arith.constant dense<0.000000e+00> : vector<8x128xf32>
    %31 = tpu.matmul %27, %30, %cst_26 {dimension_numbers = #tpu.dot_dimension_numbers<[1], [0], [0], [1], [0, 0, 1, 1], [], []>} : vector<8x16xf32>, vector<16x128xf32>, vector<8x128xf32> -> vector<8x128xf32>
    %32 = arith.addf %28, %31 : vector<8x128xf32>
    %c0_27 = arith.constant 0 : index
    %c0_28 = arith.constant 0 : index
    %33 = vector.load %arg11[%c0_27, %c0_28] : memref<8x128xf32, #tpu.memory_space<vmem>>, vector<8x128xf32>
    tpu.vector_store %arg11[%c0_27, %c0_28], %32 {strides = array<i32>} : memref<8x128xf32, #tpu.memory_space<vmem>>, vector<8x128xf32>,
    %c3_i32 = arith.constant 3 : i32
    %34 = arith.cmpi eq, %arg2, %c3_i32 : i32
    %35 = arith.extui %34 : i1 to i32
    %c0_i32_29 = arith.constant 0 : i32
    %36 = arith.cmpi ne, %35, %c0_i32_29 : i32
    scf.if %36 {
      %c0_30 = arith.constant 0 : index
      %c0_31 = arith.constant 0 : index
      %37 = vector.load %arg11[%c0_30, %c0_31] : memref<8x128xf32, #tpu.memory_space<vmem>>, vector<8x128xf32>
      %c0_32 = arith.constant 0 : index
      %c0_33 = arith.constant 0 : index
      %c0_34 = arith.constant 0 : index
      %38 = vector.load %arg10[%c0_32, %c0_33, %c0_34] : memref<1x8x128xf32, #tpu.memory_space<vmem>>, vector<1x8x128xf32>
      %39 = vector.shape_cast %38 : vector<1x8x128xf32> to vector<8x128xf32>
      %40 = vector.shape_cast %37 : vector<8x128xf32> to vector<1x8x128xf32>
      tpu.vector_store %arg10[%c0_32, %c0_33, %c0_34], %40 {strides = array<i32>} : memref<1x8x128xf32, #tpu.memory_space<vmem>>, vector<1x8x128xf32>,
    } else {
    }
    return
  }
  func.func @transform_0(%arg0: i32, %arg1: i32, %arg2: i32) -> (i32, i32, i32) {
    %c0_i32 = arith.constant 0 : i32
    %c0_i32_0 = arith.constant 0 : i32
    return %arg0, %arg1, %c0_i32 : i32, i32, i32
  }
  func.func @transform_1(%arg0: i32, %arg1: i32, %arg2: i32) -> (i32, i32, i32) {
    %c0_i32 = arith.constant 0 : i32
    %c0_i32_0 = arith.constant 0 : i32
    %c0_i32_1 = arith.constant 0 : i32
    return %arg0, %c0_i32, %c0_i32_0 : i32, i32, i32
  }
  func.func @transform_2(%arg0: i32, %arg1: i32, %arg2: i32) -> (i32, i32, i32) {
    %c0_i32 = arith.constant 0 : i32
    %c0_i32_0 = arith.constant 0 : i32
    %c0_i32_1 = arith.constant 0 : i32
    return %arg2, %c0_i32, %c0_i32_0 : i32, i32, i32
  }
  func.func @transform_3(%arg0: i32, %arg1: i32, %arg2: i32) -> (i32, i32, i32) {
    %c0_i32 = arith.constant 0 : i32
    %c0_i32_0 = arith.constant 0 : i32
    %c0_i32_1 = arith.constant 0 : i32
    return %arg2, %c0_i32, %c0_i32_0 : i32, i32, i32
  }
  func.func @transform_4(%arg0: i32, %arg1: i32, %arg2: i32) -> (i32, i32, i32) {
    %c0_i32 = arith.constant 0 : i32
    %c0_i32_0 = arith.constant 0 : i32
    %c0_i32_1 = arith.constant 0 : i32
    return %arg2, %c0_i32, %c0_i32_0 : i32, i32, i32
  }
  func.func @transform_5(%arg0: i32, %arg1: i32, %arg2: i32) -> (i32, i32, i32) {
    %c0_i32 = arith.constant 0 : i32
    %c0_i32_0 = arith.constant 0 : i32
    %c0_i32_1 = arith.constant 0 : i32
    return %arg2, %c0_i32, %c0_i32_0 : i32, i32, i32
  }
  func.func @transform_6(%arg0: i32, %arg1: i32, %arg2: i32) -> (i32, i32) {
    %c0_i32 = arith.constant 0 : i32
    %c0_i32_0 = arith.constant 0 : i32
    %c0_i32_1 = arith.constant 0 : i32
    return %c0_i32, %c0_i32_0 : i32, i32
  }
  func.func @transform_7(%arg0: i32, %arg1: i32, %arg2: i32) -> (i32, i32, i32) {
    %c0_i32 = arith.constant 0 : i32
    %c0_i32_0 = arith.constant 0 : i32
    return %arg0, %arg1, %c0_i32 : i32, i32, i32
  }
}

</mosaic_0001>

<bundles_post_ra>
// kernel: tpu_custom_call.1
= control target key start
LH: loop header
LB: loop body
LE: loop exit
PB: predicated region body
PF: predicated region fallthrough
CT: control target
= control target key end

     0   :  { %s1579_s0 = inlined_call_operand.vmem [shape: f32[2,8,32], index: 0, kind: input, shape index: {}]   ;;  %s1580_s1 = inlined_call_operand.vmem [shape: f32[2,8,32], index: 1, kind: input, shape index: {}]   ;;  %s1581_s2 = inlined_call_operand.vmem [shape: f32[4,32,16], index: 2, kind: input, shape index: {}]   ;;  %s1582_s3 = inlined_call_operand.vmem [shape: f32[4,32,16], index: 3, kind: input, shape index: {}]   ;;  %s1583_s4 = inlined_call_operand.vmem [shape: f32[4,32,16], index: 4, kind: input, shape index: {}]   ;;  %s1584_s5 = inlined_call_operand.vmem [shape: f32[4,16,128], index: 5, kind: input, shape index: {}]   ;;  %s1585_s6 = inlined_call_operand.vmem [shape: f32[1,128], index: 6, kind: input, shape index: {}]   ;;  %s1586_s7 = inlined_call_operand.hbm [shape: f32[2,8,128], index: 7, kind: output, shape index: {}]  }
   0x1   :  { %1596 = sst [smem:[#allocation15_spill]] %s1579_s0 }
   0x2   :  { %12 = vsyncpa [#allocation4], 0 }
   0x3   :  { %14 = vsyncpa [#allocation4 + $0x1], 0  ;;  %s1389_s24 = smov 0   ;;  %s1391_s25 = smov 0  }
   0x4   :  { %s1393_s26 = smov 0   ;;  %s1395_s27 = smov 0  }
   0x5   :  { %s1397_s28 = smov 0   ;;  %s1399_s29 = smov 0  }
   0x6   :  { %s1401_s30 = smov 0   ;;  %s1403_s8 = smov 0  }
   0x7 LB: > { %1597 = sst [smem:[#allocation6_spill]] %s1315_s24  ;;  %s1044_s9 = sadd.s32 4294967295, %s1343_s8   ;;  %s1343_s8 = sphi %s1403_s8, %s20_s8   ;;  %s1339_s30 = sphi %s1401_s30, %s1618_s30   ;;  %s1335_s29 = sphi %s1399_s29, %s1617_s29   ;;  %s1331_s28 = sphi %s1397_s28, %s1616_s28   ;;  %s1327_s27 = sphi %s1395_s27, %s1615_s27   ;;  %s1323_s26 = sphi %s1393_s26, %s1614_s26   ;;  %s1319_s25 = sphi %s1391_s25, %s1620_s25   ;;  %s1315_s24 = sphi %s1389_s24, %s1619_s24  }
   0x8   : > { %1598 = sst [smem:[#allocation7_spill]] %s1323_s26  ;;  %s1045_s10 = sadd.s32 4294967294, %s1343_s8  }
   0x9   : > { %1599 = sst [smem:[#allocation8_spill]] %s1335_s29  ;;  %s32_s11 = sadd.s32 1, %s1335_s29 }
   0xa   : > { %1600 = sst [smem:[#allocation9_spill]] %s1339_s30  ;;  %p33_p0 = scmp.ge.s32.totalorder %s32_s11, 4 }
   0xb   : > { %1601 = sst [smem:[#allocation10_spill]] %s1343_s8  ;;  %s39_s12 = sadd.s32 1, %s1339_s30 }
   0xc   : > { %p237_p1 = scmp.ne.s32.totalorder %s1323_s26, %s1319_s25  ;;  %p238_p2 = scmp.eq.s32.totalorder %s1044_s9, 7 }
   0xd   : > { %s1622_s11 = smov (%p33_p0, %s32_s11), 0  ;;  %s1624_s12 = smov (!%p33_p0, %s39_s12), %s1339_s30 }
   0xe   : > { %1602 = sst [smem:[#allocation11_spill]] %s1622_s11  ;;  %p1438_p3 = por %p238_p2, %p237_p1 }
   0xf   : > { %p243_p4 = scmp.ne.s32.totalorder %s1319_s25, %s1315_s24  ;;  %p41_p5 = scmp.ge.s32.totalorder %s1624_s12, 2 }
  0x10   : > { %p244_p6 = scmp.eq.s32.totalorder %s1045_s10, 7  ;;  %p1048_p7 = scmp.ge.s32.totalorder %s1343_s8, 1 }
  0x11   : > { %p314_p8 = scmp.lt.s32.totalorder %s1343_s8, 9  ;;  %s1626_s12 = smov (%p41_p5, %s1624_s12), 0 }
  0x12   : > { %1604 = sst [smem:[#allocation12_spill]] %s1626_s12  ;;  %p1448_p9 = por %p244_p6, %p243_p4 }
  0x13   : > { %p315_p10 = pnand %p1048_p7, %p314_p8  ;;  %s222_s15 = ssub.s32 %s1339_s30, %s1626_s12 }
  0x14   : > { %s1605_s14 = scalar_select %p1448_p9, 1, 0 }
  0x15   : > { %s227_s16 = sadd.s32 1, %s1323_s26  ;;  %p225_p11 = scmp.eq.s32.totalorder %s222_s15, 0 }
  0x16   : > { %1606 = sst [smem:[#allocation13_spill]] %s1605_s14  ;;  %318 = sbr.rel (%p315_p10) target bundleno = 1249 (0x4e1), region = 48 }
  0x17   : > { %s1456_s17 = scalar_select %p225_p11, %s1323_s26, %s227_s16  }
  0x18   : > { %s1590_s18 = sand.u32 (!%p315_p10), 1, %s1319_s25   ;;  %p372_p12 = scmp.lt.s32.totalorder (!%p315_p10), %s1331_s28, 1 }
  0x19   : > { %1607 = sst [smem:[#allocation14_spill]] %s1456_s17  ;;  %s1462_s19 = sshll.u32 (!%p315_p10), %s1590_s18, 3 }
  0x1a   : > { %p383_p13 = scmp.lt.s32.totalorder (!%p315_p10), %s1327_s27, 3  ;;  %s1608_s0 = sld [smem:[#allocation15_spill]] (!%p315_p10) }
  0x1b   : > { %s371_s15 = scalar_lea.vmem (!%p315_p10), [#allocation3], %s1462_s19  ;;  %p1060_p0 = scmp.ne.s32.totalorder (!%p315_p10), %s1327_s27, 0 }
  0x1d   : > { %s373_s20 = scalar_select %p372_p12, %s1331_s28, 1 }
  0x1e   : > { %s384_s21 = scalar_select %p383_p13, %s1327_s27, 3 }
  0x1f   : > { %s1050_s22 = sshll.u32 %s373_s20, 3  ;;  %406 = sbr.rel (%p1060_p0) target bundleno = 38 (0x26), region = 52  ;;  %v1061_v0 = vld [vmem:[%s1585_s6] ss:$0 sm:$0xff] (!%p1060_p0) }
  0x20   : > { %s1470_s10 = scalar_lea.vmem %s1608_s0, %s1050_s22  ;;  %s1475_s12 = scalar_lea.vmem %s1580_s1, %s1050_s22  ;;  %414 = vst [vmem:[#allocation2] sm:$0xff] (!%p1060_p0), %v1061_v0 }
  0x21   : > { %s1074_s11 = sshll.u32 %s384_s21, 5  ;;  %s1077_s30 = sshll.u32 %s384_s21, 4 }
  0x22   : > { %s387_s17 = scalar_lea.vmem %s1581_s2, %s1074_s11  ;;  %s392_s20 = scalar_lea.vmem %s1582_s3, %s1074_s11 }
  0x23   : > { %s1486_s23 = scalar_lea.vmem %s1583_s4, %s1074_s11  ;;  %s1491_s22 = scalar_lea.vmem %s1584_s5, %s1077_s30 }
  0x26 PF: > { %v495_v1 = vld [vmem:[%s392_s20] sm:$0xff]  ;;  %v496_v2 = vld [vmem:[%s392_s20 + $0x8] sm:$0xff]  ;;  %v1345_v4 = vmov 0.0|0.0   ;;  %v497_v7 = vld [vmem:[%s392_s20 + $0x10] sm:$0xff]  ;;  %vm1346_vm0 = vmmov 0   ;;  %v1347_v10 = vmov 0.0  }
  0x27   : > { %v417_v3 = vld [vmem:[%s387_s17] sm:$0xff]  ;;  %1156 = vmatprep.subr.bf16.mxu1 %v1345_v4  ;;  %v1157_v5 = vpack.c.bf16 %v496_v2, %v495_v1  ;;  %1150 = vmatprep.subr.bf16.mxu0 %v1345_v4  ;;  %v418_v6 = vld [vmem:[%s387_s17 + $0x8] sm:$0xff]  ;;  %v498_v8 = vld [vmem:[%s392_s20 + $0x18] sm:$0xff]  ;;  %vm421_vm1 = vcmask 261120   ;;  %vm646_vm2 = vcmask 130048   ;;  %vm723_vm3 = vcmask 64512  }
  0x28   : > { %v1151_v9 = vpack.c.bf16 %v418_v6, %v417_v3  ;;  %1119 = vmatprep.mubr.msk.f32.mxu1 %vm1346_vm0, %v1347_v10  ;;  %v419_v11 = vld [vmem:[%s387_s17 + $0x10] sm:$0xff]  ;;  %v420_v12 = vld [vmem:[%s387_s17 + $0x18] sm:$0xff]  ;;  %1108 = vmatprep.mubr.msk.f32.mxu0 %vm1346_vm0, %v1347_v10  ;;  %v1160_v13 = vpack.c.bf16 %v498_v8, %v497_v7  ;;  %v416_v15 = vld [vmem:[%s1475_s12] sm:$0xff]  ;;  %p1069_p1 = scmp.ne.s32.totalorder %s1327_s27, 3 }
  0x29   : > { %1158 = vmatpush3.bf16.msra.mxu1 %v1157_v5  ;;  %v1154_v14 = vpack.c.bf16 %v420_v12, %v419_v11  ;;  %v415_v16 = vld [vmem:[%s1470_s10] sm:$0xff]  ;;  %v573_v22 = vld [vmem:[%s1486_s23 + $0x8] sm:$0xff]  ;;  %v574_v23 = vld [vmem:[%s1486_s23 + $0x10] sm:$0xff] }
  0x2a   : > { %1152 = vmatpush3.bf16.msra.mxu0 %v1151_v9  ;;  %1159 = vmatprep.subr.bf16.mxu1 %v1345_v4  ;;  %v572_v21 = vld [vmem:[%s1486_s23] sm:$0xff]  ;;  %v575_v25 = vld [vmem:[%s1486_s23 + $0x18] sm:$0xff]  ;;  %v810_v38 = vld [vmem:[%s1491_s22 + $0x8] sm:$0xff] }
  0x2b   : > { %1153 = vmatprep.subr.bf16.mxu0 %v1345_v4  ;;  %v1163_v24 = vpack.c.bf16 %v573_v22, %v572_v21  ;;  %v1166_v26 = vpack.c.bf16 %v575_v25, %v574_v23  ;;  %v809_v37 = vld [vmem:[%s1491_s22] sm:$0xff] }
  0x2c   : > { %v1169_v39 = vpack.c.bf16 %v810_v38, %v809_v37  ;;  %v808_v45 = vld [vmem:[#allocation2] sm:$0xff] }
  0x2d   : > { %1161 = vmatpush3.bf16.msra.mxu1 %v1160_v13 }
  0x2e   : > { %1155 = vmatpush3.bf16.msra.mxu0 %v1154_v14  ;;  %1133 = vmatprep.subr.mxu1 %v1347_v10 }
  0x2f   : > { %1162 = vmatprep.subr.bf16.mxu0 %v1345_v4 }
  0x30   : > { %1120 = vmatmul.mubr.msk.f32.vlgmr.msra.gmra.mrb[0].mxu1 %vm421_vm1, %v416_v15 }
  0x31   : > { %1109 = vmatmul.mubr.msk.f32.vlgmr.msra.gmra.mrb[0].mxu0 %vm421_vm1, %v415_v16  ;;  %1135 = vmatprep.mubr.msk.f32.mxu1 %vm1346_vm0, %v1347_v10 }
  0x32   : > { %1130 = vmatprep.mubr.msk.f32.mxu0 %vm1346_vm0, %v1347_v10  ;;  %1164 = vmatpush3.bf16.msra.mxu0 %v1163_v24 }
  0x33   : > { %1165 = vmatprep.subr.bf16.mxu0 %v1345_v4 }
  0x36   : > { %1167 = vmatpush3.bf16.msra.mxu0 %v1166_v26 }
  0x37   : > { %1168 = vmatprep.subr.bf16.mxu0 %v1345_v4 }
  0x39   : > { %1131 = vmatmul.mubr.msk.f32.vlgmr.msra.gmra.mrb[2].mxu0 %vm421_vm1, %v416_v15 }
  0x3a   : > { %1147 = vmatprep.mubr.msk.f32.mxu0 %vm1346_vm0, %v1347_v10  ;;  %1170 = vmatpush3.bf16.msra.mxu0 %v1169_v39 }
 0x103   : > { %v568_v17 = vpop.f32.mrb[0].mxu1 }
 0x104   : > { %v1121_v18 = vpop.f32.mrb[1].mxu1  ;;  %1134 = vmatpush3.xpose.msk.msra.mxu1 %vm646_vm2, %v568_v17  ;;  %v491_v19 = vpop.f32.mrb[0].mxu0 }
 0x105   : > { %v1110_v20 = vpop.f32.mrb[1].mxu0  ;;  %1138 = vmatprep.subr.mxu1 %v1347_v10 }
 0x107   : > { %1136 = vmatmul.mubr.msk.f32.vlgmr.msra.gmra.mrb[2].mxu1 %vm646_vm2, %v491_v19 }
 0x108   : > { %1140 = vmatprep.mubr.msk.f32.mxu1 %vm1346_vm0, %v1347_v10 }
 0x10c   : > { %v642_v35 = vpop.f32.mrb[2].mxu0 }
 0x10d   : > { %v1132_v36 = vpop.f32.mrb[3].mxu0  ;;  %1139 = vmatpush3.msra.mxu1 %v642_v35 }
 0x1da   : > { %v719_v27 = vpop.f32.mrb[2].mxu1 }
 0x1db   : > { %v1137_v28 = vpop.f32.mrb[3].mxu1  ;;  %v724_v29 = vsel %vm723_vm3, %v719_v27, -inf }
 0x1dc   : > { %725 = vmax.xlane.f32.xlu0 %v724_v29 }
 0x269   : > { %v726_v30 = vpop.xlane.xlu0 %725 }
 0x26a   : > { %v727_v31 = vsub.f32 %v719_v27, %v726_v30 }
 0x26c   : > { %v728_v32 = vmul.f32 1.442695, %v727_v31 }
 0x26e   : > { %1245 = vpow2.f32 %v728_v32 }
 0x278   : > { %v1246_v33 = vpop.eup %1245 }
 0x279   : > { %v730_v34 = vsel %vm723_vm3, %v1246_v33, 0.0 }
 0x27a   : > { %731 = vadd.xlane.f32.xlu0 %v730_v34 }
 0x307   : > { %v732_v40 = vpop.xlane.xlu0 %731 }
 0x308   : > { %1247 = vrcp.f32 %v732_v40 }
 0x312   : > { %v1248_v41 = vpop.eup %1247 }
 0x313   : > { %v734_v42 = vmul.f32 %v1248_v41, %v1246_v33 }
 0x315   : > { %1141 = vmatmul.mubr.msk.f32.vlgmr.msra.gmra.mrb[4].mxu1 %vm723_vm3, %v734_v42 }
 0x3e8   : > { %v804_v43 = vpop.f32.mrb[4].mxu1 }
 0x3e9   : > { %v1142_v44 = vpop.f32.mrb[5].mxu1  ;;  %1148 = vmatmul.mubr.msk.f32.vlgmr.msra.gmra.mrb[4].mxu0 %vm646_vm2, %v804_v43 }
 0x4b9   : > { %889 = sbr.rel (%p1069_p1) target bundleno = 1224 (0x4c8), region = 56 }
 0x4bc   : > { %v880_v46 = vpop.f32.mrb[4].mxu0 }
 0x4bd   : > { %v884_v47 = vadd.f32 %v880_v46, %v808_v45  ;;  %v1149_v48 = vpop.f32.mrb[5].mxu0 }
 0x4bf   : > { %885 = vst [vmem:[#allocation2] sm:$0xff] %v884_v47 }
 0x4c6   : > { %v890_v49 = vld [vmem:[#allocation2] sm:$0xff] }
 0x4c7   : > { %891 = vst [vmem:[%s371_s15] sm:$0xff] %v890_v49 }
 0x4c8 PF: > { %s1071_s0 = sshll.u32 %s1331_s28, 7  ;;  %s907_s8 = sshll.u32 %s371_s15, 4  ;;  %s908_s8 = int_to_ptr.vmem [resolvable:$true] %s907_s8 }
 0x4c9   : > { %s1528_s30 = scalar_lea.hbm %s1586_s7, %s1071_s0  ;;  %s1609_s27 = sand.u32 1, %s1319_s25  }
 0x4ca   : > { %s893_s11 = scalar_lea.sflag [#allocation4], %s1609_s27  ;;  %s1249_s12 = scalar_lea.vmem %s908_s8, 128 }
 0x4cb   : > { %p1250_p2 = scmp.ne.s32.totalorder %s908_s8, %s1249_s12  ;;  %s1348_s14 = smov [#allocation3]  }
 0x4cc   : > { %s1253_s17 = sshll.u32 %s1348_s14, 4  ;;  %s1254_s17 = int_to_ptr.vmem [resolvable:$false] %s1253_s17 }
 0x4cd   : > { %p1251_p4 = pnand %p1250_p2, %p1438_p3  ;;  %s1255_s21 = scalar_lea.vmem %s1254_s17, 256 }
 0x4ce   : > { %p1256_p6 = scmp.lt.s32.totalorder %s908_s8, %s1254_s17  ;;  %p1257_p7 = scmp.lt.s32.totalorder %s1255_s21, %s1249_s12 }
 0x4cf   : > { %p1252_p5 = pneg %p1251_p4 }
 0x4d0   : > { %p1258_p8 = por %p1257_p7, %p1256_p6 }
 0x4d2   : > { %p1259_p10 = pnand %p1258_p8, %p1252_p5 }
 0x4d4   : > { %1262 = shalt.err (!%p1259_p10)
}
 0x4d5   : > { %s1263_s28 = scalar_lea.hbm %s1528_s30, 128  ;;  %s1267_s16 = scalar_lea.hbm %s1586_s7, 256 }
 0x4d6   : > { %p1264_p11 = scmp.ne.s32.totalorder %s1528_s30, %s1263_s28  ;;  %p1268_p0 = scmp.lt.u32.totalorder %s1528_s30, %s1586_s7 }
 0x4d7   : > { %p1269_p1 = scmp.lt.u32.totalorder %s1267_s16, %s1263_s28  ;;  %p1271_p4 = scmp.lt.u32.totalorder %s1263_s28, %s1528_s30 }
 0x4d8   : > { %p1265_p12 = pnand %p1264_p11, %p1438_p3 }
 0x4d9   : > { %p1270_p2 = por %p1269_p1, %p1268_p0 }
 0x4da   : > { %p1266_p13 = pneg %p1265_p12 }
 0x4db   : > { %p1272_p5 = por %p1271_p4, %p1270_p2 }
 0x4dd   : > { %p1273_p6 = pnand %p1272_p5, %p1266_p13 }
 0x4df   : > { %1276 = shalt.err (!%p1273_p6)
}
 0x4e0   : > { %1171 = dma.vmem_to_hbm [thread:$0]  (%p1438_p3), %s908_s8, 128, %s1528_s30, %s893_s11  }
 0x4e1 PF: > { %s1610_s9 = sld [smem:[#allocation10_spill]]  ;;  %s1611_s22 = sld [smem:[#allocation6_spill]] }
 0x4e7   : > { %p1177_p7 = scmp.ge.s32.totalorder %s1610_s9, 2  ;;  %s919_s29 = sand.u32 1, %s1611_s22  }
 0x4e8   : > { %s920_s18 = scalar_lea.sflag [#allocation4], %s919_s29 }
 0x4e9   : > { %p1174_p8 = pnand %p1177_p7, %p1448_p9 }
 0x4eb   : > { %1310 = dma.done.wait (!%p1174_p8), %s920_s18, 128  }
 0x4ec   : > { %1312 = vsyncadd (!%p1174_p8), %s920_s18, 4294967168  ;;  %s20_s8 = sadd.s32 1, %s1610_s9   ;;  %s1613_s0 = sld [smem:[#allocation7_spill]] }
 0x4ed   : > { %p17_p10 = scmp.ge.s32.totalorder %s20_s8, 10   ;;  %s1614_s26 = sld [smem:[#allocation14_spill]] }
 0x4ee   : > { %s1615_s27 = sld [smem:[#allocation8_spill]]  ;;  %s1616_s28 = sld [smem:[#allocation9_spill]] }
 0x4ef   : > { %s1617_s29 = sld [smem:[#allocation11_spill]]  ;;  %s1618_s30 = sld [smem:[#allocation12_spill]] }
 0x4f0   : > { %s1619_s24 = smov %s1319_s25  ;;  %19 = sbr.rel (!%p17_p10) target bundleno = 7 (0x7), region = 106 }
 0x4f2   : > { %s1620_s25 = smov %s1613_s0 }
 0x4f7   :  { %925 = vsyncpa [#allocation4], 1 }
 0x4f8   :  { %927 = vsyncpa [#allocation4 + $0x1], 1 }

</bundles_post_ra>
